<compile_context>
chip_gen: v5e
topology: v5e:2x2
jax: 0.10.0
libtpu: 0.0.40
codegen_flags: <defaults>
</compile_context>

<pallas_src>
import functools

import jax
import jax.numpy as jnp
from jax import lax
from jax.experimental import pallas as pl
from jax.experimental.pallas import tpu as pltpu


def _round_up(x: int, m: int) -> int:
    return ((x + m - 1) // m) * m


@functools.lru_cache(maxsize=1)
def _vmem_budget() -> int:
    """Generation-aware scoped-VMEM budget (leaves headroom for Mosaic scratch)."""
    try:
        cap = int(pltpu.get_tpu_info().vmem_capacity_bytes)
    except Exception:  # pragma: no cover - conservative fallback
        cap = 128 * 1024 * 1024
    # ~96 MiB on 128 MiB parts (v5e/v6e), ~48 MiB on v7x's 64 MiB.
    return int(cap * 0.75)


# --------------------------------------------------------------------------
# Kernels
# --------------------------------------------------------------------------
def _resblock_full_kernel(x_ref, w_ref, b_ref, o_ref):
    """Full-width tile: o = x + SiLU(x @ W + b); W is [in, out], resident."""
    x = x_ref[...]                               # (TM, Hp), original dtype
    y = lax.dot_general(
        x.astype(w_ref.dtype), w_ref[...],       # bf16 x bf16 on the MXU
        dimension_numbers=(((1,), (0,)), ((), ())),
        preferred_element_type=jnp.float32)
    y = y + b_ref[...].astype(jnp.float32)
    act = y * jax.nn.sigmoid(y)                  # SiLU in f32 (EUP + VPU)
    o_ref[...] = (x.astype(jnp.float32) + act).astype(o_ref.dtype)


def _resblock_tiled_kernel(x_ref, w_ref, b_ref, o_ref):
    """Column-stripe tile: o[:, j*TN:(j+1)*TN] for the current N tile."""
    tn = o_ref.shape[1]
    y = lax.dot_general(
        x_ref[...].astype(w_ref.dtype), w_ref[...],    # (TM,Hp) x (Hp,TN)
        dimension_numbers=(((1,), (0,)), ((), ())),
        preferred_element_type=jnp.float32)
    y = y + b_ref[...].astype(jnp.float32)
    act = y * jax.nn.sigmoid(y)
    # Residual: pick this output tile's column stripe from the resident x block
    # (j = outer grid axis; offset is a lane-aligned multiple of TN>=128).
    col0 = pl.multiple_of(pl.program_id(0) * tn, tn)
    x_res = x_ref[:, pl.ds(col0, tn)]
    o_ref[...] = (x_res.astype(jnp.float32) + act).astype(o_ref.dtype)


# --------------------------------------------------------------------------
# Parameter preparation (one-time, outside the per-call path)
# --------------------------------------------------------------------------
def prepare_resblock_params(weight, bias, compute_dtype=jnp.bfloat16):
    """Transpose W to [in, out], pad to 128-multiples, cast W to compute dtype.

    weight: [H, H] PyTorch [out, in] layout.  bias: [H].
    Returns (w_p [Hp, Hp] compute_dtype, b_p [1, Hp] float32).
    """
    H = weight.shape[0]
    Hp = _round_up(H, 128)
    w_t = weight.T                                       # [in, out]
    if Hp != H:
        w_t = jnp.pad(w_t, ((0, Hp - H), (0, Hp - H)))
        bias = jnp.pad(bias, (0, Hp - H))
    w_p = w_t.astype(compute_dtype)
    b_p = bias.astype(jnp.float32).reshape(1, Hp)
    return w_p, b_p


# --------------------------------------------------------------------------
# Forward
# --------------------------------------------------------------------------
@functools.partial(jax.jit, static_argnames=("tiled_tn",))
def resblock_forward(x, w_p, b_p, *, tiled_tn=None):
    """x: [B, S, H]; w_p/b_p from prepare_resblock_params.

    tiled_tn: debug/override knob — force the tiled-N path with this TN.
    """
    B, S, H = x.shape
    M = B * S
    Hp = w_p.shape[0]
    assert w_p.shape == (Hp, Hp) and Hp % 128 == 0 and Hp >= H
    assert b_p.shape == (1, Hp)

    x_isz = jnp.dtype(x.dtype).itemsize
    w_isz = jnp.dtype(w_p.dtype).itemsize
    o_isz = x_isz
    budget = _vmem_budget()

    # Dtype-aware sublane multiple for the activation / output tiles.
    sub = 8 if x_isz == 4 else (16 if x_isz == 2 else 32)
    tm_full = min(512, _round_up(M, sub))
    tm_cands = sorted({tm_full, min(tm_full, 256), min(tm_full, 128)}, reverse=True)

    def full_bytes(tm):
        # Double-buffered x/out tiles + (double-buffered, fetched-once) W + bias.
        return 2 * (tm * Hp * (x_isz + o_isz) + Hp * Hp * w_isz + Hp * 4)

    TM = None
    use_full = tiled_tn is None
    if use_full:
        for tm in tm_cands:
            if full_bytes(tm) <= budget:
                TM = tm
                break
        if TM is None:
            use_full = False

    if not use_full:
        if tiled_tn is not None:
            assert Hp % tiled_tn == 0 and tiled_tn % 128 == 0
            tn_cands = [tiled_tn]
        else:
            tn_cands = [t for t in (1024, 512, 256, 128) if Hp % t == 0]

        def tiled_bytes(tm, tn):
            return 2 * (tm * Hp * x_isz + Hp * tn * w_isz + tn * 4 + tm * tn * o_isz)

        TN = None
        for tn in tn_cands:                 # prefer the largest TN (intensity lever)
            for tm in tm_cands:             # then the largest TM that still fits
                if tiled_bytes(tm, tn) <= budget:
                    TM, TN = tm, tn
                    break
            if TN is not None:
                break
        if TN is None:                      # last resort: smallest tiles
            TM, TN = tm_cands[-1], tn_cands[-1]

    Mp = _round_up(M, TM)
    num_m = Mp // TM

    # Pad activations only when needed (pads contribute exact zeros).
    x2d = x.reshape(M, H)
    if Mp != M or Hp != H:
        x2d = jnp.pad(x2d, ((0, Mp - M), (0, Hp - H)))

    if use_full:
        # Weight fully VMEM-resident; x / W / out each touch HBM exactly once.
        out_p = pl.pallas_call(
            _resblock_full_kernel,
            out_shape=jax.ShapeDtypeStruct((Mp, Hp), x.dtype),
            grid_spec=pltpu.PrefetchScalarGridSpec(
                num_scalar_prefetch=0,
                grid=(num_m,),
                in_specs=[
                    pl.BlockSpec((TM, Hp), lambda i: (i, 0)),   # x row stripe
                    pl.BlockSpec((Hp, Hp), lambda i: (0, 0)),   # W [in, out], resident
                    pl.BlockSpec((1, Hp), lambda i: (0, 0)),    # bias
                ],
                out_specs=pl.BlockSpec((TM, Hp), lambda i: (i, 0)),
            ),
            compiler_params=pltpu.CompilerParams(
                dimension_semantics=("parallel",),              # megacore-splittable
                vmem_limit_bytes=budget,
            ),
        )(x2d, w_p, b_p)
    else:
        num_n = Hp // TN
        out_p = pl.pallas_call(
            _resblock_tiled_kernel,
            out_shape=jax.ShapeDtypeStruct((Mp, Hp), x.dtype),
            grid_spec=pltpu.PrefetchScalarGridSpec(
                num_scalar_prefetch=0,
                # N outer, M inner -> the W / bias stripe stays VMEM-resident
                # across the whole M sweep (fetched once per column stripe).
                grid=(num_n, num_m),
                in_specs=[
                    pl.BlockSpec((TM, Hp), lambda j, i: (i, 0)),   # x row stripe
                    pl.BlockSpec((Hp, TN), lambda j, i: (0, j)),   # W [in, out] stripe
                    pl.BlockSpec((1, TN), lambda j, i: (0, j)),    # bias stripe
                ],
                out_specs=pl.BlockSpec((TM, TN), lambda j, i: (i, j)),
            ),
            compiler_params=pltpu.CompilerParams(
                dimension_semantics=("parallel", "parallel"),
                vmem_limit_bytes=budget,
            ),
        )(x2d, w_p, b_p)

    out = out_p
    if Mp != M or Hp != H:
        out = out_p[:M, :H]
    return out.reshape(B, S, H)


# --------------------------------------------------------------------------
# Self-test
# --------------------------------------------------------------------------
def _mixed_precision_ref(x, weight, bias, compute_dtype=jnp.bfloat16):
    """Same math as the kernel: bf16 matmul operands, f32 accum + epilogue."""
    y = jnp.dot(
        x.astype(compute_dtype), weight.T.astype(compute_dtype),
        preferred_element_type=jnp.float32) + bias.astype(jnp.float32)
    return x.astype(jnp.float32) + y * jax.nn.sigmoid(y)


if __name__ == "__main__":
    key = jax.random.PRNGKey(0)
    k_x, k_w, k_b = jax.random.split(key, 3)

    # ---- primary check: B=2, S=8, hidden=32 (full-weight-resident path) ----
    B, S, H = 2, 8, 32
    x = jax.random.normal(k_x, (B, S, H), dtype=jnp.float32)
    weight = jax.random.normal(k_w, (H, H), dtype=jnp.float32) * 0.05
    bound = 1.0 / (H ** 0.5)
    bias = jax.random.uniform(k_b, (H,), minval=-bound, maxval=bound,
                              dtype=jnp.float32)

    w_p, b_p = prepare_resblock_params(weight, bias)
    out = resblock_forward(x, w_p, b_p)
    jax.block_until_ready(out)
    assert out.shape == x.shape

    ref = _mixed_precision_ref(x, weight, bias)
    assert jnp.allclose(out, ref, atol=2e-3, rtol=2e-3), "mismatch vs mixed-prec ref"
    y32 = x @ weight.T + bias
    ref32 = x + y32 * jax.nn.sigmoid(y32)
    assert jnp.allclose(out, ref32, atol=3e-2, rtol=3e-2), "mismatch vs f32 ref"

    # ---- module's actual init: zero weights (exact path) -------------------
    w0_p, b0_p = prepare_resblock_params(jnp.zeros((H, H), jnp.float32), bias)
    out0 = resblock_forward(x, w0_p, b0_p)
    jax.block_until_ready(out0)
    y0 = jnp.zeros_like(x) + bias
    ref0 = x + y0 * jax.nn.sigmoid(y0)
    assert jnp.allclose(out0, ref0, atol=1e-5, rtol=1e-5), "mismatch (zero W)"

    # ---- secondary check: exercise the tiled-N fallback path (num_n > 1) ---
    H2 = 256
    k_x2, k_w2, k_b2 = jax.random.split(jax.random.PRNGKey(1), 3)
    x2 = jax.random.normal(k_x2, (B, S, H2), dtype=jnp.float32)
    weight2 = jax.random.normal(k_w2, (H2, H2), dtype=jnp.float32) * 0.05
    bias2 = jax.random.uniform(k_b2, (H2,), minval=-1.0 / (H2 ** 0.5),
                               maxval=1.0 / (H2 ** 0.5), dtype=jnp.float32)
    w2_p, b2_p = prepare_resblock_params(weight2, bias2)
    out2 = resblock_forward(x2, w2_p, b2_p, tiled_tn=128)
    jax.block_until_ready(out2)
    ref2 = _mixed_precision_ref(x2, weight2, bias2)
    assert jnp.allclose(out2, ref2, atol=2e-3, rtol=2e-3), "mismatch (tiled path)"

    print("KERNEL_OK")
</pallas_src>

<mosaic_0001>
module attributes {stable_mosaic.version = 11 : i64} {
  func.func @_resblock_full_kernel(%arg0: i32, %arg1: memref<16x128xf32, #tpu.memory_space<vmem>>, %arg2: memref<128x128xbf16, #tpu.memory_space<vmem>>, %arg3: memref<1x128xf32, #tpu.memory_space<vmem>>, %arg4: memref<16x128xf32, #tpu.memory_space<vmem>>) attributes {dimension_semantics = [#tpu.dimension_semantics<parallel>], iteration_bounds = array<i64: 1>, scalar_prefetch = 0 : i64, scratch_operands = 0 : i64, tpu.core_type = #tpu.core_type<tc>, window_params = [{transform_indices = @transform_0, window_bounds = array<i64: 16, 128>}, {pipeline_mode = #tpu.pipeline_mode<synchronous>, transform_indices = @transform_1, window_bounds = array<i64: 128, 128>}, {pipeline_mode = #tpu.pipeline_mode<synchronous>, transform_indices = @transform_2, window_bounds = array<i64: 1, 128>}, {transform_indices = @transform_3, window_bounds = array<i64: 16, 128>}]} {
    %c0 = arith.constant 0 : index
    %c0_0 = arith.constant 0 : index
    %0 = vector.load %arg1[%c0, %c0_0] : memref<16x128xf32, #tpu.memory_space<vmem>>, vector<16x128xf32>
    %1 = arith.truncf %0 : vector<16x128xf32> to vector<16x128xbf16>
    %c0_1 = arith.constant 0 : index
    %c0_2 = arith.constant 0 : index
    %2 = vector.load %arg2[%c0_1, %c0_2] : memref<128x128xbf16, #tpu.memory_space<vmem>>, vector<128x128xbf16>
    %cst = arith.constant dense<0.000000e+00> : vector<16x128xf32>
    %3 = tpu.matmul %1, %2, %cst {dimension_numbers = #tpu.dot_dimension_numbers<[1], [0], [0], [1], [0, 0, 1, 1], [], []>} : vector<16x128xbf16>, vector<128x128xbf16>, vector<16x128xf32> -> vector<16x128xf32>
    %c0_3 = arith.constant 0 : index
    %c0_4 = arith.constant 0 : index
    %4 = vector.load %arg3[%c0_3, %c0_4] : memref<1x128xf32, #tpu.memory_space<vmem>>, vector<1x128xf32>
    %5 = vector.broadcast %4 : vector<1x128xf32> to vector<16x128xf32>
    %6 = arith.addf %3, %5 : vector<16x128xf32>
    %7 = arith.negf %6 : vector<16x128xf32>
    %8 = math.exp %7 : vector<16x128xf32>
    %cst_5 = arith.constant 1.000000e+00 : f32
    %9 = vector.broadcast %cst_5 : f32 to vector<16x128xf32>
    %10 = arith.addf %9, %8 : vector<16x128xf32>
    %11 = arith.divf %9, %10 : vector<16x128xf32>
    %12 = arith.mulf %6, %11 : vector<16x128xf32>
    %13 = arith.addf %0, %12 : vector<16x128xf32>
    %c0_6 = arith.constant 0 : index
    %c0_7 = arith.constant 0 : index
    %14 = vector.load %arg4[%c0_6, %c0_7] : memref<16x128xf32, #tpu.memory_space<vmem>>, vector<16x128xf32>
    tpu.vector_store %arg4[%c0_6, %c0_7], %13 {strides = array<i32>} : memref<16x128xf32, #tpu.memory_space<vmem>>, vector<16x128xf32>,
    return
  }
  func.func @transform_0(%arg0: i32) -> (i32, i32) {
    %c0_i32 = arith.constant 0 : i32
    %c0_i32_0 = arith.constant 0 : i32
    return %arg0, %c0_i32 : i32, i32
  }
  func.func @transform_1(%arg0: i32) -> (i32, i32) {
    %c0_i32 = arith.constant 0 : i32
    %c0_i32_0 = arith.constant 0 : i32
    %c0_i32_1 = arith.constant 0 : i32
    return %c0_i32, %c0_i32_0 : i32, i32
  }
  func.func @transform_2(%arg0: i32) -> (i32, i32) {
    %c0_i32 = arith.constant 0 : i32
    %c0_i32_0 = arith.constant 0 : i32
    %c0_i32_1 = arith.constant 0 : i32
    return %c0_i32, %c0_i32_0 : i32, i32
  }
  func.func @transform_3(%arg0: i32) -> (i32, i32) {
    %c0_i32 = arith.constant 0 : i32
    %c0_i32_0 = arith.constant 0 : i32
    return %arg0, %c0_i32 : i32, i32
  }
}

</mosaic_0001>

<bundles_post_ra>
// kernel: resblock_forward.1
= control target key start
LH: loop header
LB: loop body
LE: loop exit
PB: predicated region body
PF: predicated region fallthrough
CT: control target
= control target key end

     0   :  { %8 = vsyncpa [#allocation3], 0  ;;  %s244_s15 = smov [#allocation2]   ;;  %s245_s17 = smov 64   ;;  %s285_s0 = inlined_call_operand.vmem [shape: f32[16,128], index: 0, kind: input, shape index: {}]   ;;  %s286_s1 = inlined_call_operand.hbm [shape: bf16[128,128], index: 1, kind: input, shape index: {}]   ;;  %s287_s2 = inlined_call_operand.vmem [shape: f32[1,128], index: 2, kind: input, shape index: {}]   ;;  %s288_s3 = inlined_call_operand.vmem [shape: f32[16,128], index: 3, kind: output, shape index: {}]  }
   0x1   :  { %s15_s14 = sshll.u32 %s286_s1, 4  ;;  %s17_s16 = sshll.u32 %s244_s15, 4  ;;  %s16_s14 = int_to_ptr.hbm [resolvable:$true] %s15_s14  ;;  %s18_s16 = int_to_ptr.vmem [resolvable:$true] %s17_s16 }
   0x2   :  { %s246_s18 = smov 4  }
   0x3   :  { %23 = dma.hbm_to_vmem [thread:$0]  %s16_s14, 1024, %s18_s16, [#allocation3], %s245_s17, %s245_s17, %s246_s18  }
   0x4   :  { %242 = dma.done.wait [#allocation3], 1024  }
   0x5   :  { %243 = vsyncadd [#allocation3], 4294966272  ;;  %v205_v0 = vld [vmem:[#allocation2 + $0x38] sm:$0xff]  ;;  %v204_v1 = vld [vmem:[#allocation2 + $0x30] sm:$0xff] }
   0x6   :  { %101 = vmatpush.bf16.msra.mxu0 %v205_v0  ;;  %v203_v2 = vld [vmem:[#allocation2 + $0x28] sm:$0xff]  ;;  %v202_v3 = vld [vmem:[#allocation2 + $0x20] sm:$0xff]  ;;  %v201_v4 = vld [vmem:[#allocation2 + $0x18] sm:$0xff] }
   0x7   :  { %v200_v5 = vld [vmem:[#allocation2 + $0x10] sm:$0xff]  ;;  %v199_v6 = vld [vmem:[#allocation2 + $0x8] sm:$0xff]  ;;  %v198_v7 = vld [vmem:[#allocation2] sm:$0xff] }
   0x8   :  { %v30_v8 = vld [vmem:[%s285_s0] sm:$0xff]  ;;  %v31_v9 = vld [vmem:[%s285_s0 + $0x8] sm:$0xff] }
   0x9   :  { %v32_v10 = vpack.c.bf16 %v31_v9, %v30_v8  ;;  %v209_v11 = vld [vmem:[%s287_s2] ss:$0 sm:$0xff] }
   0xa   :  { %102 = vmatpush.bf16.msra.mxu0 %v204_v1 }
   0xe   :  { %103 = vmatpush.bf16.msra.mxu0 %v203_v2 }
  0x12   :  { %104 = vmatpush.bf16.msra.mxu0 %v202_v3 }
  0x16   :  { %105 = vmatpush.bf16.msra.mxu0 %v201_v4 }
  0x1a   :  { %106 = vmatpush.bf16.msra.mxu0 %v200_v5 }
  0x1e   :  { %107 = vmatpush.bf16.msra.mxu0 %v199_v6 }
  0x22   :  { %108 = vmatpush.bf16.msra.mxu0 %v198_v7 }
  0x25   :  { %109 = vmatmul.bf16.vlgmr.msra.gmra.mxu0 %v32_v10 }
  0xa2   :  { %v110_v12 = vpop.f32.mrf.mxu0 }
  0xa3   :  { %v111_v13 = vadd.f32 %v209_v11, %v110_v12 }
  0xa5   :  { %v196_v14 = vmul.f32 -1.442695, %v111_v13 }
  0xa7   :  { %210 = vpow2.f32 %v196_v14 }
  0xaa   :  { %v112_v15 = vpop.f32.mrf.mxu0 }
  0xab   :  { %v113_v16 = vadd.f32 %v209_v11, %v112_v15 }
  0xad   :  { %v211_v17 = vpop.eup %210  ;;  %v197_v18 = vmul.f32 -1.442695, %v113_v16 }
  0xae   :  { %v121_v19 = vadd.f32 1.0, %v211_v17 }
  0xaf   :  { %212 = vpow2.f32 %v197_v18 }
  0xb0   :  { %214 = vrcp.f32 %v121_v19  ;;  %v134_v25 = vand.u32 2147483648, %v121_v19  ;;  %v132_v27 = vand.u32 2147483647, %v121_v19  ;;  %vm128_vm1 = vweird.f32 %v121_v19 }
  0xb2   :  { %v135_v30 = vor.u32 1.1754944e-38, %v134_v25  ;;  %vm133_vm3 = vcmp.eq.f32.partialorder %v132_v27, 8.507059e+37 }
  0xb5   :  { %v213_v20 = vpop.eup %212 }
  0xb6   :  { %v215_v21 = vpop.eup %214  ;;  %v122_v22 = vadd.f32 1.0, %v213_v20 }
  0xb7   :  { %v124_v23 = vmul.f32 %v215_v21, %v121_v19  ;;  %vm129_vm0 = vweird.f32 %v215_v21 }
  0xb8   :  { %216 = vrcp.f32 %v122_v22  ;;  %vm130_vm2 = vmor %vm128_vm1, %vm129_vm0  ;;  %v149_v36 = vand.u32 2147483648, %v122_v22  ;;  %v147_v39 = vand.u32 2147483647, %v122_v22  ;;  %vm143_vm5 = vweird.f32 %v122_v22 }
  0xb9   :  { %v125_v24 = vsub.f32 1.0, %v124_v23 }
  0xba   :  { %v150_v41 = vor.u32 1.1754944e-38, %v149_v36  ;;  %vm148_vm7 = vcmp.eq.f32.partialorder %v147_v39, 8.507059e+37 }
  0xbb   :  { %v126_v26 = vmul.f32 %v215_v21, %v125_v24 }
  0xbd   :  { %v127_v28 = vadd.f32 %v215_v21, %v126_v26 }
  0xbe   :  { %v217_v29 = vpop.eup %216 }
  0xbf   :  { %v131_v31 = vsel %vm130_vm2, %v215_v21, %v127_v28  ;;  %v139_v32 = vmul.f32 %v217_v29, %v122_v22  ;;  %vm144_vm4 = vweird.f32 %v217_v29 }
  0xc0   :  { %v136_v33 = vsel %vm133_vm3, %v135_v30, %v131_v31  ;;  %vm145_vm6 = vmor %vm143_vm5, %vm144_vm4 }
  0xc1   :  { %v153_v34 = vmul.f32 %v136_v33, %v111_v13  ;;  %v140_v35 = vsub.f32 1.0, %v139_v32 }
  0xc3   :  { %v155_v37 = vadd.f32 %v153_v34, %v30_v8  ;;  %v141_v38 = vmul.f32 %v217_v29, %v140_v35 }
  0xc5   :  { %157 = vst [vmem:[%s288_s3] sm:$0xff] %v155_v37  ;;  %v142_v40 = vadd.f32 %v217_v29, %v141_v38 }
  0xc7   :  { %v146_v42 = vsel %vm145_vm6, %v217_v29, %v142_v40 }
  0xc8   :  { %v151_v43 = vsel %vm148_vm7, %v150_v41, %v146_v42 }
  0xc9   :  { %v154_v44 = vmul.f32 %v151_v43, %v113_v16 }
  0xcb   :  { %v156_v45 = vadd.f32 %v154_v44, %v31_v9 }
  0xcd   :  { %158 = vst [vmem:[%s288_s3 + $0x8] sm:$0xff] %v156_v45 }
  0xce   :  { %163 = vsyncpa [#allocation3], 1 }

</bundles_post_ra>
